<compile_context>
chip_gen: v6e
topology: v6e:2x2x1
jax: 0.10.0
libtpu: 0.0.40
codegen_flags: <defaults>
</compile_context>

<pallas_src>
import jax
import jax.numpy as jnp
from jax.experimental import pallas as pl
from jax.experimental.pallas import tpu as pltpu

EPS = 1e-5


def transpose_ln_kernel(x_ref, g_ref, b_ref, o_ref):
    # x_ref: (b_blk, C, l_tile) -- C on sublanes, L tile on lanes.
    x = x_ref[...].astype(jnp.float32)
    # Fused single pass over C: accumulate E[x] and E[x^2] together.
    mean = jnp.mean(x, axis=-2, keepdims=True)
    mean_sq = jnp.mean(x * x, axis=-2, keepdims=True)
    var = jnp.maximum(mean_sq - mean * mean, 0.0)        # biased var, like torch LN
    inv = jax.lax.rsqrt(var + EPS)                        # EUP rsqrt
    # g_ref/b_ref are (C, 1) f32: broadcast over batch (leading) and lane (L) axes.
    y = (x - mean) * inv * g_ref[...] + b_ref[...]
    o_ref[...] = y.astype(o_ref.dtype)


def _default_tile_budget_bytes():
    """Tile budget covering 2 input + 2 output pipeline buffers, per generation."""
    try:
        vmem = int(getattr(pltpu.get_tpu_info(), "vmem_capacity_bytes", 64 << 20))
    except Exception:
        vmem = 64 << 20  # conservative: assume the smallest (v7x per-TC) VMEM
    # ~1/3 of physical VMEM for pipelined tiles, capped so v5e/v6e stay sane.
    return int(max(8 << 20, min(vmem // 3, 40 << 20)))


def _pick_l_tile(B, C, L, in_b, out_b, tile_budget_bytes):
    """Lane-dense L tile (multiple of 128 or full extent) fitting the budget."""
    per_elem = 2 * (in_b + out_b)                         # double-buffered in + out
    # NOTE: the C*128 floor can exceed the nominal budget for very large C; the
    # explicit vmem_limit_bytes below is sized to the *actual* tile in that case.
    budget_elems = max(tile_budget_bytes // per_elem, C * 128)
    max_lanes = max(128, (budget_elems // max(C, 1)) // 128 * 128)
    l_tile = L if L <= max_lanes else max_lanes
    # v7x has 2 TensorCores: if batch alone can't feed both and L has room,
    # split L into >= 2 lane-dense blocks (no effect on v5e/v6e, 1 TC).
    if B == 1 and l_tile >= L and L >= 256:
        l_tile = max(128, ((pl.cdiv(L, 2) + 127) // 128) * 128)
    return l_tile


def _pick_b_blk(B, C, l_tile, n_l, in_b, out_b, tile_budget_bytes):
    """Batch blocking for the small-L regime so each grid step moves >=~128 KiB."""
    if n_l > 1 or B <= 1:
        return 1
    tile_elems = C * l_tile
    target_elems = (128 * 1024) // (in_b + out_b)         # ~128 KiB of in+out per step
    b_blk = max(1, min(B, target_elems // max(tile_elems, 1)))
    budget_elems = max(tile_budget_bytes // (2 * (in_b + out_b)), tile_elems)
    b_blk = min(b_blk, max(1, budget_elems // tile_elems))
    # Keep >= 2 grid steps when possible so both v7x TensorCores get work.
    while b_blk > 1 and pl.cdiv(B, b_blk) < 2:
        b_blk //= 2
    return max(1, b_blk)


def transpose_ln(x, gamma, beta, *, b_blk=None, l_tile=None, tile_budget_bytes=None):
    """x: (B, C, L); gamma, beta: (C,). Returns (B, C, L)."""
    B, C, L = x.shape
    in_b = jnp.dtype(x.dtype).itemsize
    out_b = in_b                                          # output matches input dtype

    if tile_budget_bytes is None:
        tile_budget_bytes = _default_tile_budget_bytes()
    if l_tile is None:
        l_tile = _pick_l_tile(B, C, L, in_b, out_b, tile_budget_bytes)
    n_l = pl.cdiv(L, l_tile)
    if b_blk is None:
        b_blk = _pick_b_blk(B, C, l_tile, n_l, in_b, out_b, tile_budget_bytes)
    n_b = pl.cdiv(B, b_blk)

    g = gamma.reshape(C, 1).astype(jnp.float32)
    bt = beta.reshape(C, 1).astype(jnp.float32)

    # Explicit scoped-VMEM limit sized to the actual double-buffered tiles
    # (+ gamma/beta + slack), capped at v7x's 64 MiB physical per TC.
    buf_bytes = 2 * b_blk * C * l_tile * (in_b + out_b) + 4 * C * 4
    vmem_limit = int(min(max(buf_bytes + (4 << 20), 16 << 20), 64 << 20))

    cost = pl.CostEstimate(
        flops=8 * B * C * L,
        transcendentals=B * L,
        bytes_accessed=x.size * (in_b + out_b) + 2 * C * 4,
    )

    return pl.pallas_call(
        transpose_ln_kernel,
        out_shape=jax.ShapeDtypeStruct((B, C, L), x.dtype),
        grid_spec=pltpu.PrefetchScalarGridSpec(
            num_scalar_prefetch=0,
            grid=(n_b, n_l),
            in_specs=[
                pl.BlockSpec((b_blk, C, l_tile), lambda bi, li: (bi, 0, li)),
                # gamma/beta: constant block index -> loaded once, stays resident.
                pl.BlockSpec((C, 1), lambda bi, li: (0, 0)),
                pl.BlockSpec((C, 1), lambda bi, li: (0, 0)),
            ],
            out_specs=pl.BlockSpec((b_blk, C, l_tile), lambda bi, li: (bi, 0, li)),
        ),
        compiler_params=pltpu.CompilerParams(
            dimension_semantics=("parallel", "parallel"),
            vmem_limit_bytes=vmem_limit,
        ),
        cost_estimate=cost,
    )(x, g, bt)


def transpose_ln_ref(x, gamma, beta):
    # Pure-JAX reference mirroring the PyTorch module (compute in f32).
    xt = jnp.swapaxes(x, 1, -1).astype(jnp.float32)        # (B, L, C)
    mean = jnp.mean(xt, axis=-1, keepdims=True)
    var = jnp.mean((xt - mean) ** 2, axis=-1, keepdims=True)
    y = (xt - mean) / jnp.sqrt(var + EPS) * gamma.astype(jnp.float32) \
        + beta.astype(jnp.float32)
    return jnp.swapaxes(y, 1, -1)


if __name__ == "__main__":
    key = jax.random.PRNGKey(0)
    k1, k2, k3, k4, kg, kb = jax.random.split(key, 6)

    # Case 1: small shape, default LayerNorm init (weight=1, bias=0).
    B, C, L = 2, 32, 16
    x = jax.random.normal(k1, (B, C, L), dtype=jnp.float32)
    gamma = jnp.ones((C,), dtype=jnp.float32)
    beta = jnp.zeros((C,), dtype=jnp.float32)
    out = jax.block_until_ready(transpose_ln(x, gamma, beta))
    ref = transpose_ln_ref(x, gamma, beta)
    assert out.shape == (B, C, L)
    assert jnp.max(jnp.abs(out - ref)) < 2e-4, "case 1 mismatch vs reference"

    # Case 2: lane-dense L (multiple of 128) and non-trivial affine params.
    B2, C2, L2 = 2, 32, 256
    x2 = jax.random.normal(k2, (B2, C2, L2), dtype=jnp.float32)
    gamma2 = 1.0 + 0.1 * jax.random.normal(kg, (C2,), dtype=jnp.float32)
    beta2 = 0.1 * jax.random.normal(kb, (C2,), dtype=jnp.float32)
    out2 = jax.block_until_ready(transpose_ln(x2, gamma2, beta2))
    ref2 = transpose_ln_ref(x2, gamma2, beta2)
    assert jnp.max(jnp.abs(out2 - ref2)) < 2e-4, "case 2 mismatch vs reference"

    # Case 3: partial tail L block, C not a multiple of 8, partial batch block.
    B3, C3, L3 = 3, 20, 160
    x3 = jax.random.normal(k3, (B3, C3, L3), dtype=jnp.float32)
    gamma3 = 1.0 + 0.05 * jax.random.normal(kg, (C3,), dtype=jnp.float32)
    beta3 = 0.05 * jax.random.normal(kb, (C3,), dtype=jnp.float32)
    out3 = jax.block_until_ready(transpose_ln(x3, gamma3, beta3, b_blk=2, l_tile=128))
    ref3 = transpose_ln_ref(x3, gamma3, beta3)
    assert jnp.max(jnp.abs(out3 - ref3)) < 2e-4, "case 3 mismatch vs reference"

    # Case 4: bf16 I/O (dtype-aware tiling path; compute stays f32 in-kernel).
    B4, C4, L4 = 2, 16, 128
    x4 = jax.random.normal(k4, (B4, C4, L4), dtype=jnp.float32).astype(jnp.bfloat16)
    gamma4 = jnp.ones((C4,), dtype=jnp.float32)
    beta4 = jnp.zeros((C4,), dtype=jnp.float32)
    out4 = jax.block_until_ready(transpose_ln(x4, gamma4, beta4))
    ref4 = transpose_ln_ref(x4, gamma4, beta4)
    assert out4.dtype == jnp.bfloat16
    assert jnp.max(jnp.abs(out4.astype(jnp.float32) - ref4)) < 4e-2, "case 4 mismatch"

    print("KERNEL_OK")
</pallas_src>

<mosaic_0001>
module attributes {stable_mosaic.version = 11 : i64} {
  func.func @transpose_ln_kernel(%arg0: i32, %arg1: i32, %arg2: memref<1x32x16xf32, #tpu.memory_space<vmem>>, %arg3: memref<32x1xf32, #tpu.memory_space<vmem>>, %arg4: memref<32x1xf32, #tpu.memory_space<vmem>>, %arg5: memref<1x32x16xf32, #tpu.memory_space<vmem>>) attributes {dimension_semantics = [#tpu.dimension_semantics<parallel>, #tpu.dimension_semantics<parallel>], iteration_bounds = array<i64: 2, 1>, scalar_prefetch = 0 : i64, scratch_operands = 0 : i64, tpu.core_type = #tpu.core_type<tc>, window_params = [{transform_indices = @transform_0, window_bounds = array<i64: 1, 32, 16>}, {pipeline_mode = #tpu.pipeline_mode<synchronous>, transform_indices = @transform_1, window_bounds = array<i64: 32, 1>}, {pipeline_mode = #tpu.pipeline_mode<synchronous>, transform_indices = @transform_2, window_bounds = array<i64: 32, 1>}, {transform_indices = @transform_3, window_bounds = array<i64: 1, 32, 16>}]} {
    %c0 = arith.constant 0 : index
    %c0_0 = arith.constant 0 : index
    %c0_1 = arith.constant 0 : index
    %0 = vector.load %arg2[%c0, %c0_0, %c0_1] : memref<1x32x16xf32, #tpu.memory_space<vmem>>, vector<1x32x16xf32>
    %cst = arith.constant dense<0.000000e+00> : vector<1x16xf32>
    %1 = vector.multi_reduction <add>, %0, %cst [1] : vector<1x32x16xf32> to vector<1x16xf32>
    %2 = vector.shape_cast %1 : vector<1x16xf32> to vector<1x1x16xf32>
    %cst_2 = arith.constant 3.200000e+01 : f32
    %3 = vector.broadcast %cst_2 : f32 to vector<1x1x16xf32>
    %4 = arith.divf %2, %3 : vector<1x1x16xf32>
    %5 = arith.mulf %0, %0 : vector<1x32x16xf32>
    %cst_3 = arith.constant dense<0.000000e+00> : vector<1x16xf32>
    %6 = vector.multi_reduction <add>, %5, %cst_3 [1] : vector<1x32x16xf32> to vector<1x16xf32>
    %7 = vector.shape_cast %6 : vector<1x16xf32> to vector<1x1x16xf32>
    %cst_4 = arith.constant 3.200000e+01 : f32
    %8 = vector.broadcast %cst_4 : f32 to vector<1x1x16xf32>
    %9 = arith.divf %7, %8 : vector<1x1x16xf32>
    %10 = arith.mulf %4, %4 : vector<1x1x16xf32>
    %11 = arith.subf %9, %10 : vector<1x1x16xf32>
    %cst_5 = arith.constant 0.000000e+00 : f32
    %12 = vector.broadcast %cst_5 : f32 to vector<1x1x16xf32>
    %13 = arith.maximumf %11, %12 : vector<1x1x16xf32>
    %cst_6 = arith.constant 9.99999974E-6 : f32
    %14 = vector.broadcast %cst_6 : f32 to vector<1x1x16xf32>
    %15 = arith.addf %13, %14 : vector<1x1x16xf32>
    %16 = math.rsqrt %15 : vector<1x1x16xf32>
    %17 = vector.broadcast %4 : vector<1x1x16xf32> to vector<1x32x16xf32>
    %18 = arith.subf %0, %17 : vector<1x32x16xf32>
    %19 = vector.broadcast %16 : vector<1x1x16xf32> to vector<1x32x16xf32>
    %20 = arith.mulf %18, %19 : vector<1x32x16xf32>
    %c0_7 = arith.constant 0 : index
    %c0_8 = arith.constant 0 : index
    %21 = vector.load %arg3[%c0_7, %c0_8] : memref<32x1xf32, #tpu.memory_space<vmem>>, vector<32x1xf32>
    %22 = vector.shape_cast %21 : vector<32x1xf32> to vector<1x32x1xf32>
    %23 = vector.broadcast %22 : vector<1x32x1xf32> to vector<1x32x16xf32>
    %24 = arith.mulf %20, %23 : vector<1x32x16xf32>
    %c0_9 = arith.constant 0 : index
    %c0_10 = arith.constant 0 : index
    %25 = vector.load %arg4[%c0_9, %c0_10] : memref<32x1xf32, #tpu.memory_space<vmem>>, vector<32x1xf32>
    %26 = vector.shape_cast %25 : vector<32x1xf32> to vector<1x32x1xf32>
    %27 = vector.broadcast %26 : vector<1x32x1xf32> to vector<1x32x16xf32>
    %28 = arith.addf %24, %27 : vector<1x32x16xf32>
    %c0_11 = arith.constant 0 : index
    %c0_12 = arith.constant 0 : index
    %c0_13 = arith.constant 0 : index
    %29 = vector.load %arg5[%c0_11, %c0_12, %c0_13] : memref<1x32x16xf32, #tpu.memory_space<vmem>>, vector<1x32x16xf32>
    tpu.vector_store %arg5[%c0_11, %c0_12, %c0_13], %28 {strides = array<i32>} : memref<1x32x16xf32, #tpu.memory_space<vmem>>, vector<1x32x16xf32>,
    return
  }
  func.func @transform_0(%arg0: i32, %arg1: i32) -> (i32, i32, i32) {
    %c0_i32 = arith.constant 0 : i32
    %c0_i32_0 = arith.constant 0 : i32
    return %arg0, %c0_i32, %arg1 : i32, i32, i32
  }
  func.func @transform_1(%arg0: i32, %arg1: i32) -> (i32, i32) {
    %c0_i32 = arith.constant 0 : i32
    %c0_i32_0 = arith.constant 0 : i32
    %c0_i32_1 = arith.constant 0 : i32
    return %c0_i32, %c0_i32_0 : i32, i32
  }
  func.func @transform_2(%arg0: i32, %arg1: i32) -> (i32, i32) {
    %c0_i32 = arith.constant 0 : i32
    %c0_i32_0 = arith.constant 0 : i32
    %c0_i32_1 = arith.constant 0 : i32
    return %c0_i32, %c0_i32_0 : i32, i32
  }
  func.func @transform_3(%arg0: i32, %arg1: i32) -> (i32, i32, i32) {
    %c0_i32 = arith.constant 0 : i32
    %c0_i32_0 = arith.constant 0 : i32
    return %arg0, %c0_i32, %arg1 : i32, i32, i32
  }
}

</mosaic_0001>

<bundles_post_ra>
// kernel: tpu_custom_call.1
= control target key start
LH: loop header
LB: loop body
LE: loop exit
PB: predicated region body
PF: predicated region fallthrough
CT: control target
= control target key end

     0   :  { %s483_s12 = smov 0   ;;  %s485_s13 = smov 0   ;;  %s563_s0 = inlined_call_operand.vmem [shape: f32[2,32,16], index: 0, kind: input, shape index: {}]   ;;  %s564_s1 = inlined_call_operand.vmem [shape: f32[32,1], index: 1, kind: input, shape index: {}]   ;;  %s565_s2 = inlined_call_operand.vmem [shape: f32[32,1], index: 2, kind: input, shape index: {}]   ;;  %s566_s3 = inlined_call_operand.vmem [shape: f32[2,32,16], index: 3, kind: output, shape index: {}]  }
   0x1   :  { %s487_s14 = smov 0  }
   0x2 LB: > { %s25_s15 = sadd.s32 1, %s456_s13  ;;  %p400_p0 = scmp.ge.s32.totalorder %s460_s14, 1  ;;  %s460_s14 = sphi %s487_s14, %s13_s14   ;;  %s456_s13 = sphi %s485_s13, %s568_s13   ;;  %s452_s12 = sphi %s483_s12, %s567_s12  }
   0x3   : > { %p27_p1 = scmp.ge.s32.totalorder %s25_s15, 2  ;;  %p156_p2 = scmp.lt.s32.totalorder %s460_s14, 3 }
   0x5   : > { %s570_s15 = smov (%p27_p1, %s25_s15), 0  ;;  %p157_p3 = pnand %p400_p0, %p156_p2 }
   0x6   : > { %p186_p4 = scmp.lt.s32.totalorder (!%p157_p3), %s452_s12, 1 }
   0x7   : > { %160 = sbr.rel (%p157_p3) target bundleno = 153 (0x99), region = 32 }
   0xc   : > { %v255_v0 = vld [vmem:[%s564_s1 + $0x10] sm:$0xff]  ;;  %v253_v1 = vld [vmem:[%s564_s1] sm:$0xff]  ;;  %v462_v2 = vmov 0   ;;  %v256_v3 = vld [vmem:[%s564_s1 + $0x18] sm:$0xff]  ;;  %s572_s12 = smov (!%p186_p4, %s452_s12), 1  ;;  %vm206_vm0 = vcmask 130048  }
   0xd   : > { %435 = vset.pattern.permute.xlu1 %v462_v2  ;;  %434 = vset.pattern.permute.xlu0 %v462_v2  ;;  %v254_v4 = vld [vmem:[%s564_s1 + $0x8] sm:$0xff]  ;;  %v281_v6 = vld [vmem:[%s565_s2] sm:$0xff]  ;;  %v284_v7 = vld [vmem:[%s565_s2 + $0x18] sm:$0xff]  ;;  %s407_s5 = sshll.u32 %s572_s12, 5 }
   0xe   : > { %269 = vperm.xlu1 %435, %v255_v0   ;;  %259 = vperm.xlu0 %434, %v253_v1   ;;  %v282_v5 = vld [vmem:[%s565_s2 + $0x8] sm:$0xff]  ;;  %v283_v8 = vld [vmem:[%s565_s2 + $0x10] sm:$0xff]  ;;  %s193_s8 = scalar_lea.vmem %s563_s0, %s407_s5  ;;  %s201_s11 = scalar_lea.vmem %s566_s3, %s407_s5 }
   0xf   : > { %v202_v9 = vld [vmem:[%s193_s8] sm:$0xff]  ;;  %v203_v10 = vld [vmem:[%s193_s8 + $0x8] sm:$0xff]  ;;  %v204_v15 = vld [vmem:[%s193_s8 + $0x10] sm:$0xff] }
  0x10   : > { %v207_v11 = vsel %vm206_vm0, %v202_v9, 0.0  ;;  %v208_v12 = vsel %vm206_vm0, %v203_v10, 0.0  ;;  %v222_v13 = vmul.f32 %v202_v9, %v202_v9  ;;  %v223_v14 = vmul.f32 %v203_v10, %v203_v10  ;;  %v205_v21 = vld [vmem:[%s193_s8 + $0x18] sm:$0xff] }
  0x11   : > { %v209_v16 = vadd.f32 %v208_v12, %v207_v11  ;;  %v210_v17 = vsel %vm206_vm0, %v204_v15, 0.0  ;;  %v224_v18 = vmul.f32 %v204_v15, %v204_v15  ;;  %v212_v24 = vsel %vm206_vm0, %v205_v21, 0.0 }
  0x12   : > { %274 = vperm.xlu1 %435, %v256_v3   ;;  %264 = vperm.xlu0 %434, %v254_v4   ;;  %v226_v19 = vsel %vm206_vm0, %v222_v13, 0.0  ;;  %v227_v20 = vsel %vm206_vm0, %v223_v14, 0.0  ;;  %v225_v25 = vmul.f32 %v205_v21, %v205_v21 }
  0x13   : > { %v211_v22 = vadd.f32 %v210_v17, %v209_v16  ;;  %v228_v23 = vadd.f32 %v227_v20, %v226_v19  ;;  %v229_v26 = vsel %vm206_vm0, %v224_v18, 0.0 }
  0x14   : > { %v231_v29 = vsel %vm206_vm0, %v225_v25, 0.0 }
  0x15   : > { %v213_v27 = vadd.f32 %v212_v24, %v211_v22  ;;  %v230_v28 = vadd.f32 %v229_v26, %v228_v23 }
  0x16   : > { %292 = vperm.xlu1 %435, %v282_v5   ;;  %287 = vperm.xlu0 %434, %v281_v6  }
  0x17   : > { %v214_v30 = vrot.slane %v213_v27, 4  ;;  %v232_v31 = vadd.f32 %v231_v29, %v230_v28 }
  0x19   : > { %v215_v32 = vadd.f32 %v214_v30, %v213_v27  ;;  %v233_v33 = vrot.slane %v232_v31, 4 }
  0x1a   : > { %302 = vperm.xlu1 %435, %v284_v7   ;;  %297 = vperm.xlu0 %434, %v283_v8  }
  0x1b   : > { %v216_v34 = vrot.slane %v215_v32, 2  ;;  %v234_v35 = vadd.f32 %v233_v33, %v232_v31 }
  0x1d   : > { %v217_v36 = vadd.f32 %v216_v34, %v215_v32  ;;  %v235_v37 = vrot.slane %v234_v35, 2 }
  0x1f   : > { %v218_v38 = vrot.slane %v217_v36, 1  ;;  %v236_v39 = vadd.f32 %v235_v37, %v234_v35 }
  0x21   : > { %v219_v40 = vadd.f32 %v218_v38, %v217_v36  ;;  %v237_v41 = vrot.slane %v236_v39, 1 }
  0x23   : > { %v221_v42 = vmul.f32 0.03125, %v219_v40  ;;  %v238_v43 = vadd.f32 %v237_v41, %v236_v39 }
  0x25   : > { %v239_v44 = vmul.f32 0.03125, %v238_v43  ;;  %v240_v45 = vmul.f32 %v221_v42, %v221_v42  ;;  %v245_v49 = vsub.f32 %v202_v9, %v221_v42  ;;  %v246_v50 = vsub.f32 %v203_v10, %v221_v42 }
  0x26   : > { %v247_v54 = vsub.f32 %v204_v15, %v221_v42  ;;  %v248_v56 = vsub.f32 %v205_v21, %v221_v42 }
  0x27   : > { %v241_v46 = vsub.f32 %v239_v44, %v240_v45 }
  0x29   : > { %v242_v47 = vmax.f32 %v241_v46, 0.0 }
  0x2b   : > { %v243_v48 = vadd.f32 1e-05, %v242_v47 }
  0x2d   : > { %436 = vrsqrt.f32 %v243_v48 }
  0x3a   : > { %v437_v51 = vpop.eup %436 }
  0x3b   : > { %v249_v55 = vmul.f32 %v437_v51, %v245_v49  ;;  %v250_v57 = vmul.f32 %v437_v51, %v246_v50  ;;  %v251_v60 = vmul.f32 %v437_v51, %v247_v54  ;;  %v252_v62 = vmul.f32 %v437_v51, %v248_v56 }
  0x89   : > { %v270_v52 = vpop.permute.xlu1 %269  ;;  %v260_v53 = vpop.permute.xlu0 %259 }
  0x8a   : > { %v277_v61 = vmul.f32 %v260_v53, %v249_v55  ;;  %v279_v4 = vmul.f32 %v270_v52, %v251_v60 }
  0x8d   : > { %v275_v58 = vpop.permute.xlu1 %274  ;;  %v265_v59 = vpop.permute.xlu0 %264 }
  0x8e   : > { %v278_v63 = vmul.f32 %v265_v59, %v250_v57  ;;  %v280_v5 = vmul.f32 %v275_v58, %v252_v62 }
  0x91   : > { %v293_v0 = vpop.permute.xlu1 %292  ;;  %v288_v1 = vpop.permute.xlu0 %287 }
  0x92   : > { %v306_v2 = vadd.f32 %v293_v0, %v278_v63  ;;  %v305_v3 = vadd.f32 %v288_v1, %v277_v61 }
  0x94   : > { %310 = vst.msk [vmem:[%s201_s11 + $0x8] sm:$0xff] %vm206_vm0, %v306_v2  ;;  %309 = vst.msk [vmem:[%s201_s11] sm:$0xff] %vm206_vm0, %v305_v3 }
  0x95   : > { %v303_v6 = vpop.permute.xlu1 %302  ;;  %v298_v7 = vpop.permute.xlu0 %297 }
  0x96   : > { %v308_v8 = vadd.f32 %v303_v6, %v280_v5  ;;  %v307_v9 = vadd.f32 %v298_v7, %v279_v4 }
  0x98   : > { %312 = vst.msk [vmem:[%s201_s11 + $0x18] sm:$0xff] %vm206_vm0, %v308_v8  ;;  %311 = vst.msk [vmem:[%s201_s11 + $0x10] sm:$0xff] %vm206_vm0, %v307_v9 }
  0x99 PF: > { %s13_s14 = sadd.s32 1, %s460_s14   ;;  %s567_s12 = smov %s456_s13 }
  0x9a   : > { %p10_p5 = scmp.ge.s32.totalorder %s13_s14, 4   ;;  %s568_s13 = smov %s570_s15 }
  0x9c   :  { %12 = sbr.rel (!%p10_p5) target bundleno = 2 (0x2), region = 62 }

</bundles_post_ra>
